<compile_context>
chip_gen: v5e
topology: v5e:2x2
jax: 0.10.0
libtpu: 0.0.40
codegen_flags: <defaults>
</compile_context>

<pallas_src>
import functools

import jax
import jax.numpy as jnp
from jax.experimental import pallas as pl
from jax.experimental.pallas import tpu as pltpu

_VMEM_LIMIT = 32 * 1024 * 1024  # explicit scoped-VMEM budget for every pallas_call


# ----------------------------------------------------------------------------
# Small helpers
# ----------------------------------------------------------------------------
def _round_up(x, m):
    return ((x + m - 1) // m) * m


def _cdiv(a, b):
    return (a + b - 1) // b


@functools.lru_cache(maxsize=None)
def _num_tensorcores():
    """Best-effort TensorCore-per-chip count (v7x: 2; v5e/v6e: 1). Conservative."""
    try:
        info = pltpu.get_tpu_info()
    except Exception:
        return 1
    for name in ("num_tensorcores", "num_cores", "core_count", "tensorcore_count"):
        v = getattr(info, name, None)
        if isinstance(v, int) and 0 < v <= 8:
            return v
    return 1


# ----------------------------------------------------------------------------
# Pallas kernels
# ----------------------------------------------------------------------------
def _mm_bias_kernel(x_ref, w_ref, b_ref, *rest, relu6, has_res):
    """One (tm, tn) output tile: bf16 MXU matmul over the full K + f32 epilogue."""
    if has_res:
        res_ref, o_ref = rest
    else:
        (o_ref,) = rest
    y = jnp.dot(x_ref[...].astype(jnp.bfloat16), w_ref[...],
                preferred_element_type=jnp.float32)
    y = y + b_ref[...]
    if has_res:
        y = y + res_ref[...].astype(jnp.float32)     # residual cast in-kernel
    if relu6:
        y = jnp.minimum(jnp.maximum(y, 0.0), 6.0)
    o_ref[...] = y.astype(o_ref.dtype)


def _dw_kernel(x_ref, w_ref, b_ref, o_ref, xpad_ref, *, stride, relu6):
    """Depthwise 3x3 conv (+folded BN, +ReLU6), stride handled in-kernel.

    x_ref:    (H, W, tc)        unpadded input plane for this (n, c-block)
    w_ref:    (9, 1, tc)        per-tap per-channel weights (BN scale folded)
    b_ref:    (1, tc)           folded BN bias
    o_ref:    (toh, Wo, tc)     output rows [h*toh, h*toh + toh)
    xpad_ref: (Hpad, Wpad, tc)  zero-padded copy of the plane (VMEM scratch,
                                filled once per (n, c) at h == 0; Wpad 8-aligned)
    """
    H, W = x_ref.shape[0], x_ref.shape[1]
    Hpad, Wpad, tc = xpad_ref.shape
    toh, Wo, _ = o_ref.shape
    h = pl.program_id(2)

    @pl.when(h == 0)
    def _fill_padded_plane():
        dt = xpad_ref.dtype
        xpad_ref[0:1, :, :] = jnp.zeros((1, Wpad, tc), dt)                # top pad row
        if Hpad > H + 1:                                                  # bottom pad rows
            xpad_ref[H + 1:Hpad, :, :] = jnp.zeros((Hpad - H - 1, Wpad, tc), dt)
        xpad_ref[1:H + 1, 0:1, :] = jnp.zeros((H, 1, tc), dt)             # left pad col
        xpad_ref[1:H + 1, W + 1:Wpad, :] = jnp.zeros((H, Wpad - W - 1, tc), dt)  # right
        r0 = 0
        while r0 < H:                                                     # interior copy
            nr = min(8, H - r0)
            xpad_ref[1 + r0:1 + r0 + nr, 1:W + 1, :] = x_ref[r0:r0 + nr, :, :]
            r0 += nr

    # Hoist the 9 tap weights and the bias once.
    wt = [w_ref[t] for t in range(9)]          # each (1, tc), f32
    bias = b_ref[...]                          # (1, tc), f32

    base = h * (stride * toh)                  # padded-row base for this output tile
    for r in range(toh):                       # static, fully unrolled
        acc = jnp.zeros((Wo, tc), jnp.float32)
        for di in range(3):
            prow = base + stride * r + di      # dynamic outer-axis row index
            for dj in range(3):
                if stride == 1:
                    slab = xpad_ref[prow, pl.ds(dj, Wo), :]
                else:
                    slab = xpad_ref[prow, pl.ds(dj, Wo, stride=stride), :]
                acc = acc + slab.astype(jnp.float32) * wt[di * 3 + dj]
        y = acc + bias
        if relu6:
            y = jnp.minimum(jnp.maximum(y, 0.0), 6.0)
        o_ref[r] = y.astype(o_ref.dtype)


# ----------------------------------------------------------------------------
# Wrappers / glue
# ----------------------------------------------------------------------------
def matmul_bias_pallas(x2d, w2d_bf16, bias, relu6=False, residual=None,
                       out_dtype=jnp.bfloat16):
    """y = epilogue(x2d @ w2d) with fused bias, optional residual, optional ReLU6."""
    M, K = x2d.shape
    Kw, N = w2d_bf16.shape
    assert K == Kw

    tn = N if N <= 256 else 256                # full-dim block or 128-multiple
    tm = min(512, _round_up(M, 8))
    gm, gn = _cdiv(M, tm), _cdiv(N, tn)
    # Only split M when a 2nd TensorCore exists (v7x) and the grid collapsed to 1.
    if gm * gn == 1 and M > 8 and _num_tensorcores() > 1:
        tm = _round_up(_cdiv(M, 2), 8)
        gm = _cdiv(M, tm)

    in_specs = [
        pl.BlockSpec((tm, K), lambda i, j: (i, 0)),
        pl.BlockSpec((K, tn), lambda i, j: (0, j)),
        pl.BlockSpec((1, tn), lambda i, j: (0, j)),
    ]
    args = [x2d, w2d_bf16, bias.reshape(1, N).astype(jnp.float32)]
    has_res = residual is not None
    if has_res:
        in_specs.append(pl.BlockSpec((tm, tn), lambda i, j: (i, j)))
        args.append(residual)                  # native dtype; cast in-kernel

    kernel = functools.partial(_mm_bias_kernel, relu6=relu6, has_res=has_res)
    return pl.pallas_call(
        kernel,
        out_shape=jax.ShapeDtypeStruct((M, N), out_dtype),
        grid_spec=pltpu.PrefetchScalarGridSpec(
            num_scalar_prefetch=0,
            grid=(gm, gn),
            in_specs=in_specs,
            out_specs=pl.BlockSpec((tm, tn), lambda i, j: (i, j)),
        ),
        compiler_params=pltpu.CompilerParams(
            dimension_semantics=("parallel", "parallel"),
            vmem_limit_bytes=_VMEM_LIMIT,
        ),
    )(*args)


def pointwise_conv_bn(x, w, scale, bias, relu6, residual=None,
                      out_dtype=jnp.bfloat16):
    """1x1 Conv(bias=False) + folded BN (+residual) (+ReLU6).  x: NHWC, w: (Cin, Cout)."""
    N, H, W, Cin = x.shape
    Cout = w.shape[1]
    x2d = x.reshape(N * H * W, Cin)
    w_folded = (w * scale[None, :]).astype(jnp.bfloat16)   # fold BN scale (weights are tiny)
    res2d = residual.reshape(N * H * W, Cout) if residual is not None else None
    y2d = matmul_bias_pallas(x2d, w_folded, bias, relu6=relu6, residual=res2d,
                             out_dtype=out_dtype)
    return y2d.reshape(N, H, W, Cout)


def depthwise_conv3x3_bn(x, w, scale, bias, stride, relu6=True, out_dtype=None):
    """Depthwise 3x3 conv (groups=C, padding=1, stride) + folded BN + ReLU6.

    x: NHWC (any float dtype), w: (3, 3, C).  Stride and spatial zero-padding are
    handled entirely inside the kernel; no HBM pad / decimation passes.
    """
    N, H, W, C = x.shape
    if out_dtype is None:
        out_dtype = x.dtype
    Ho = (H - 1) // stride + 1
    Wo = (W - 1) // stride + 1

    tc = C if C <= 128 else 128
    cb = _cdiv(C, tc)
    toh = min(8, Ho)                          # output rows per grid step
    hb = _cdiv(Ho, toh)
    Hpad = max(stride * (toh * hb - 1) + 3, H + 1)   # covers all tap rows, incl. overhang
    Wpad = _round_up(W + 2, 8)                        # sublane-aligned padded width

    w9 = (w * scale[None, None, :]).reshape(9, 1, C).astype(jnp.float32)
    b2 = bias.reshape(1, C).astype(jnp.float32)

    return pl.pallas_call(
        functools.partial(_dw_kernel, stride=stride, relu6=relu6),
        out_shape=jax.ShapeDtypeStruct((N, Ho, Wo, C), out_dtype),
        grid_spec=pltpu.PrefetchScalarGridSpec(
            num_scalar_prefetch=0,
            grid=(N, cb, hb),
            in_specs=[
                # Full (H, W) plane per (n, c-block); index is h-invariant so the
                # block stays resident across the inner h axis (no re-DMA).
                pl.BlockSpec((None, H, W, tc), lambda n, c, h: (n, 0, 0, c)),
                pl.BlockSpec((9, 1, tc), lambda n, c, h: (0, 0, c)),
                pl.BlockSpec((1, tc), lambda n, c, h: (0, c)),
            ],
            out_specs=pl.BlockSpec((None, toh, Wo, tc), lambda n, c, h: (n, h, 0, c)),
            scratch_shapes=[pltpu.VMEM((Hpad, Wpad, tc), x.dtype)],
        ),
        compiler_params=pltpu.CompilerParams(
            # h must be "arbitrary": the padded-plane scratch is filled at h == 0.
            dimension_semantics=("parallel", "parallel", "arbitrary"),
            vmem_limit_bytes=_VMEM_LIMIT,
        ),
    )(x, w9, b2)


# ----------------------------------------------------------------------------
# Parameters (deterministic, mirrors InvertedResidual.__init__ in eval mode)
# ----------------------------------------------------------------------------
_BN_EPS = 1e-5


def _bn_params(key, c):
    k1, k2, k3, k4 = jax.random.split(key, 4)
    gamma = 1.0 + 0.1 * jax.random.normal(k1, (c,), jnp.float32)
    beta = 0.1 * jax.random.normal(k2, (c,), jnp.float32)
    mean = 0.1 * jax.random.normal(k3, (c,), jnp.float32)
    var = 1.0 + 0.1 * jax.random.uniform(k4, (c,), jnp.float32)
    scale = gamma / jnp.sqrt(var + _BN_EPS)
    bias = beta - mean * scale
    return scale, bias


def init_inverted_residual(key, inp, oup, stride, expand_ratio):
    assert stride in (1, 2)
    hidden = int(round(inp * expand_ratio))
    keys = jax.random.split(key, 6)
    p = {"stride": stride, "inp": inp, "oup": oup}
    if expand_ratio != 1:
        p["expand_w"] = 0.1 * jax.random.normal(keys[0], (inp, hidden), jnp.float32)
        p["expand_bn"] = _bn_params(keys[1], hidden)
    p["dw_w"] = 0.1 * jax.random.normal(keys[2], (3, 3, hidden), jnp.float32)
    p["dw_bn"] = _bn_params(keys[3], hidden)
    p["proj_w"] = 0.1 * jax.random.normal(keys[4], (hidden, oup), jnp.float32)
    p["proj_bn"] = _bn_params(keys[5], oup)
    return p


# ----------------------------------------------------------------------------
# Forward pass (Pallas) + pure-JAX reference
# ----------------------------------------------------------------------------
def inverted_residual_forward(p, x):
    """InvertedResidual.forward on NHWC input.  Inter-stage tensors are bf16."""
    use_res = p["stride"] == 1 and p["inp"] == p["oup"]
    out = x
    if "expand_w" in p:
        out = pointwise_conv_bn(out, p["expand_w"], *p["expand_bn"], relu6=True,
                                out_dtype=jnp.bfloat16)
    out = depthwise_conv3x3_bn(out, p["dw_w"], *p["dw_bn"], stride=p["stride"],
                               relu6=True, out_dtype=jnp.bfloat16)
    out = pointwise_conv_bn(out, p["proj_w"], *p["proj_bn"], relu6=False,
                            residual=x if use_res else None, out_dtype=x.dtype)
    return out


def _conv_ref(x, w_hwio, stride, padding, groups=1):
    return jax.lax.conv_general_dilated(
        x, w_hwio, window_strides=(stride, stride),
        padding=[(padding, padding), (padding, padding)],
        dimension_numbers=("NHWC", "HWIO", "NHWC"),
        feature_group_count=groups)


def inverted_residual_ref(p, x):
    use_res = p["stride"] == 1 and p["inp"] == p["oup"]
    out = x
    if "expand_w" in p:
        s, b = p["expand_bn"]
        cin, cout = p["expand_w"].shape
        out = _conv_ref(out, p["expand_w"].reshape(1, 1, cin, cout), 1, 0)
        out = jnp.clip(out * s + b, 0.0, 6.0)
    s, b = p["dw_bn"]
    c = p["dw_w"].shape[-1]
    out = _conv_ref(out, p["dw_w"].reshape(3, 3, 1, c), p["stride"], 1, groups=c)
    out = jnp.clip(out * s + b, 0.0, 6.0)
    s, b = p["proj_bn"]
    cin, cout = p["proj_w"].shape
    out = _conv_ref(out, p["proj_w"].reshape(1, 1, cin, cout), 1, 0)
    out = out * s + b
    if use_res:
        out = out + x
    return out


# ----------------------------------------------------------------------------
if __name__ == "__main__":
    key = jax.random.PRNGKey(0)
    kp1, kp2, kx = jax.random.split(key, 3)

    # Small shapes: batch=2, channels=4, spatial=16.
    x_nchw = jax.random.normal(kx, (2, 4, 16, 16), jnp.float32)
    x = jnp.transpose(x_nchw, (0, 2, 3, 1))          # NCHW -> NHWC

    # Block 1: stride=1, inp==oup -> residual connection.
    p1 = init_inverted_residual(kp1, inp=4, oup=4, stride=1, expand_ratio=6)
    # Block 2: stride=2, inp!=oup -> no residual (exercises in-kernel stride-2).
    p2 = init_inverted_residual(kp2, inp=4, oup=8, stride=2, expand_ratio=6)

    y1 = inverted_residual_forward(p1, x)
    y2 = inverted_residual_forward(p2, x)
    y1, y2 = jax.block_until_ready((y1, y2))

    assert y1.shape == (2, 16, 16, 4), y1.shape
    assert y2.shape == (2, 8, 8, 8), y2.shape

    r1 = inverted_residual_ref(p1, x)
    r2 = inverted_residual_ref(p2, x)
    for y, r in ((y1, r1), (y2, r2)):
        assert bool(jnp.all(jnp.isfinite(y)))
        rel_err = float(jnp.max(jnp.abs(y - r)) / (jnp.max(jnp.abs(r)) + 1e-6))
        assert rel_err < 5e-2, rel_err   # bf16 MXU inputs / inter-stage, f32 accumulate

    print("KERNEL_OK")
</pallas_src>

<mosaic_0001>
module attributes {stable_mosaic.version = 11 : i64} {
  func.func @_mm_bias_kernel(%arg0: i32, %arg1: i32, %arg2: memref<512x4xf32, #tpu.memory_space<vmem>>, %arg3: memref<4x24xbf16, #tpu.memory_space<vmem>>, %arg4: memref<1x24xf32, #tpu.memory_space<vmem>>, %arg5: memref<512x24xbf16, #tpu.memory_space<vmem>>) attributes {dimension_semantics = [#tpu.dimension_semantics<parallel>, #tpu.dimension_semantics<parallel>], iteration_bounds = array<i64: 1, 1>, scalar_prefetch = 0 : i64, scratch_operands = 0 : i64, tpu.core_type = #tpu.core_type<tc>, window_params = [{transform_indices = @transform_0, window_bounds = array<i64: 512, 4>}, {transform_indices = @transform_1, window_bounds = array<i64: 4, 24>}, {transform_indices = @transform_2, window_bounds = array<i64: 1, 24>}, {transform_indices = @transform_3, window_bounds = array<i64: 512, 24>}]} {
    %c0 = arith.constant 0 : index
    %c0_0 = arith.constant 0 : index
    %0 = vector.load %arg2[%c0, %c0_0] : memref<512x4xf32, #tpu.memory_space<vmem>>, vector<512x4xf32>
    %1 = arith.truncf %0 : vector<512x4xf32> to vector<512x4xbf16>
    %c0_1 = arith.constant 0 : index
    %c0_2 = arith.constant 0 : index
    %2 = vector.load %arg3[%c0_1, %c0_2] : memref<4x24xbf16, #tpu.memory_space<vmem>>, vector<4x24xbf16>
    %cst = arith.constant dense<0.000000e+00> : vector<512x24xf32>
    %3 = tpu.matmul %1, %2, %cst {dimension_numbers = #tpu.dot_dimension_numbers<[1], [0], [0], [1], [0, 0, 1, 1], [], []>} : vector<512x4xbf16>, vector<4x24xbf16>, vector<512x24xf32> -> vector<512x24xf32>
    %c0_3 = arith.constant 0 : index
    %c0_4 = arith.constant 0 : index
    %4 = vector.load %arg4[%c0_3, %c0_4] : memref<1x24xf32, #tpu.memory_space<vmem>>, vector<1x24xf32>
    %5 = vector.broadcast %4 : vector<1x24xf32> to vector<512x24xf32>
    %6 = arith.addf %3, %5 : vector<512x24xf32>
    %cst_5 = arith.constant 0.000000e+00 : f32
    %7 = vector.broadcast %cst_5 : f32 to vector<512x24xf32>
    %8 = arith.maximumf %6, %7 : vector<512x24xf32>
    %cst_6 = arith.constant 6.000000e+00 : f32
    %9 = vector.broadcast %cst_6 : f32 to vector<512x24xf32>
    %10 = arith.minimumf %8, %9 : vector<512x24xf32>
    %11 = arith.truncf %10 : vector<512x24xf32> to vector<512x24xbf16>
    %c0_7 = arith.constant 0 : index
    %c0_8 = arith.constant 0 : index
    %12 = vector.load %arg5[%c0_7, %c0_8] : memref<512x24xbf16, #tpu.memory_space<vmem>>, vector<512x24xbf16>
    tpu.vector_store %arg5[%c0_7, %c0_8], %11 {strides = array<i32>} : memref<512x24xbf16, #tpu.memory_space<vmem>>, vector<512x24xbf16>,
    return
  }
  func.func @transform_0(%arg0: i32, %arg1: i32) -> (i32, i32) {
    %c0_i32 = arith.constant 0 : i32
    %c0_i32_0 = arith.constant 0 : i32
    return %arg0, %c0_i32 : i32, i32
  }
  func.func @transform_1(%arg0: i32, %arg1: i32) -> (i32, i32) {
    %c0_i32 = arith.constant 0 : i32
    %c0_i32_0 = arith.constant 0 : i32
    return %c0_i32, %arg1 : i32, i32
  }
  func.func @transform_2(%arg0: i32, %arg1: i32) -> (i32, i32) {
    %c0_i32 = arith.constant 0 : i32
    %c0_i32_0 = arith.constant 0 : i32
    return %c0_i32, %arg1 : i32, i32
  }
  func.func @transform_3(%arg0: i32, %arg1: i32) -> (i32, i32) {
    %c0_i32 = arith.constant 0 : i32
    return %arg0, %arg1 : i32, i32
  }
}

</mosaic_0001>

<bundles_post_ra>
// kernel: tpu_custom_call.1
= control target key start
LH: loop header
LB: loop body
LE: loop exit
PB: predicated region body
PF: predicated region fallthrough
CT: control target
= control target key end

     0   :  { %vm213_vm0 = vcmask 1041408   ;;  %vm116_vm1 = vcmask 31744   ;;  %vm578_vm2 = vcmask 191488   ;;  %s1255_s1 = inlined_call_operand.vmem [shape: bf16[4,24], index: 1, kind: input, shape index: {}]   ;;  %s1256_s0 = inlined_call_operand.vmem [shape: f32[512,4], index: 0, kind: input, shape index: {}]   ;;  %s1257_s2 = inlined_call_operand.vmem [shape: f32[1,24], index: 2, kind: input, shape index: {}]   ;;  %s1258_s3 = inlined_call_operand.vmem [shape: bf16[512,24], index: 3, kind: output, shape index: {}]  }
   0x1   :  { %v111_v0 = vld [vmem:[%s1255_s1] sm:$0x3]  ;;  %v16_v2 = vld [vmem:[%s1256_s0 + $0x8] sm:$0xff]  ;;  %v17_v14 = vld [vmem:[%s1256_s0 + $0x10] sm:$0xff] }
   0x2   :  { %v15_v1 = vld [vmem:[%s1256_s0] sm:$0xff]  ;;  %v215_v3 = vsel %vm213_vm0, %v111_v0, 0  ;;  %v32_v6 = vld [vmem:[%s1256_s0 + $0x88] sm:$0xff]  ;;  %v18_v15 = vld [vmem:[%s1256_s0 + $0x18] sm:$0xff] }
   0x3   :  { %v79_v4 = vpack.c.bf16 %v16_v2, %v15_v1  ;;  %v31_v5 = vld [vmem:[%s1256_s0 + $0x80] sm:$0xff]  ;;  %224 = vmatpush.bf16.msra.mxu0 %v215_v3  ;;  %679 = vmatpush.bf16.msra.mxu1 %v215_v3  ;;  %v48_v9 = vld [vmem:[%s1256_s0 + $0x108] sm:$0xff]  ;;  %v33_v16 = vld [vmem:[%s1256_s0 + $0x90] sm:$0xff]  ;;  %v80_v22 = vpack.c.bf16 %v18_v15, %v17_v14 }
   0x4   :  { %v47_v7 = vld [vmem:[%s1256_s0 + $0x100] sm:$0xff]  ;;  %v87_v8 = vpack.c.bf16 %v32_v6, %v31_v5  ;;  %v64_v11 = vld [vmem:[%s1256_s0 + $0x188] sm:$0xff]  ;;  %680 = vmatpush.bf16.msra.mxu2 %v215_v3  ;;  %681 = vmatpush.bf16.msra.mxu3 %v215_v3  ;;  %v34_v17 = vld [vmem:[%s1256_s0 + $0x98] sm:$0xff] }
   0x5   :  { %v63_v10 = vld [vmem:[%s1256_s0 + $0x180] sm:$0xff]  ;;  %v95_v12 = vpack.c.bf16 %v48_v9, %v47_v7  ;;  %v49_v18 = vld [vmem:[%s1256_s0 + $0x110] sm:$0xff]  ;;  %v50_v19 = vld [vmem:[%s1256_s0 + $0x118] sm:$0xff]  ;;  %v88_v23 = vpack.c.bf16 %v34_v17, %v33_v16 }
   0x6   :  { %v103_v13 = vpack.c.bf16 %v64_v11, %v63_v10  ;;  %647 = vmatmul.msk.bf16.vlgmr.msra.gmra.mxu0 %vm116_vm1, %v79_v4  ;;  %655 = vmatmul.msk.bf16.vlgmr.msra.gmra.mxu1 %vm116_vm1, %v87_v8  ;;  %v65_v20 = vld [vmem:[%s1256_s0 + $0x190] sm:$0xff]  ;;  %v66_v21 = vld [vmem:[%s1256_s0 + $0x198] sm:$0xff]  ;;  %v96_v24 = vpack.c.bf16 %v50_v19, %v49_v18  ;;  %v19_v26 = vld [vmem:[%s1256_s0 + $0x20] sm:$0xff] }
   0x7   :  { %663 = vmatmul.msk.bf16.vlgmr.msra.gmra.mxu2 %vm116_vm1, %v95_v12  ;;  %v104_v25 = vpack.c.bf16 %v66_v21, %v65_v20  ;;  %v20_v27 = vld [vmem:[%s1256_s0 + $0x28] sm:$0xff]  ;;  %v35_v28 = vld [vmem:[%s1256_s0 + $0xa0] sm:$0xff]  ;;  %v21_v38 = vld [vmem:[%s1256_s0 + $0x30] sm:$0xff] }
   0x8   :  { %671 = vmatmul.msk.bf16.vlgmr.msra.gmra.mxu3 %vm116_vm1, %v103_v13  ;;  %v36_v29 = vld [vmem:[%s1256_s0 + $0xa8] sm:$0xff]  ;;  %v51_v30 = vld [vmem:[%s1256_s0 + $0x120] sm:$0xff]  ;;  %v81_v34 = vpack.c.bf16 %v20_v27, %v19_v26  ;;  %v22_v39 = vld [vmem:[%s1256_s0 + $0x38] sm:$0xff] }
   0x9   :  { %v52_v31 = vld [vmem:[%s1256_s0 + $0x128] sm:$0xff]  ;;  %v67_v32 = vld [vmem:[%s1256_s0 + $0x1a0] sm:$0xff]  ;;  %v89_v35 = vpack.c.bf16 %v36_v29, %v35_v28  ;;  %v37_v40 = vld [vmem:[%s1256_s0 + $0xb0] sm:$0xff]  ;;  %v82_v46 = vpack.c.bf16 %v22_v39, %v21_v38 }
   0xa   :  { %v68_v33 = vld [vmem:[%s1256_s0 + $0x1a8] sm:$0xff]  ;;  %v97_v36 = vpack.c.bf16 %v52_v31, %v51_v30  ;;  %v38_v41 = vld [vmem:[%s1256_s0 + $0xb8] sm:$0xff]  ;;  %v53_v42 = vld [vmem:[%s1256_s0 + $0x130] sm:$0xff] }
   0xb   :  { %v105_v37 = vpack.c.bf16 %v68_v33, %v67_v32  ;;  %v54_v43 = vld [vmem:[%s1256_s0 + $0x138] sm:$0xff]  ;;  %v69_v44 = vld [vmem:[%s1256_s0 + $0x1b0] sm:$0xff]  ;;  %v90_v47 = vpack.c.bf16 %v38_v41, %v37_v40  ;;  %v23_v50 = vld [vmem:[%s1256_s0 + $0x40] sm:$0xff] }
   0xc   :  { %v70_v45 = vld [vmem:[%s1256_s0 + $0x1b8] sm:$0xff]  ;;  %v98_v48 = vpack.c.bf16 %v54_v43, %v53_v42  ;;  %v24_v51 = vld [vmem:[%s1256_s0 + $0x48] sm:$0xff]  ;;  %v39_v52 = vld [vmem:[%s1256_s0 + $0xc0] sm:$0xff] }
   0xd   :  { %v106_v49 = vpack.c.bf16 %v70_v45, %v69_v44  ;;  %v40_v53 = vld [vmem:[%s1256_s0 + $0xc8] sm:$0xff]  ;;  %v55_v54 = vld [vmem:[%s1256_s0 + $0x140] sm:$0xff]  ;;  %v83_v58 = vpack.c.bf16 %v24_v51, %v23_v50  ;;  %v25_v62 = vld [vmem:[%s1256_s0 + $0x50] sm:$0xff] }
   0xe   :  { %v56_v55 = vld [vmem:[%s1256_s0 + $0x148] sm:$0xff]  ;;  %v71_v56 = vld [vmem:[%s1256_s0 + $0x1c0] sm:$0xff]  ;;  %v91_v59 = vpack.c.bf16 %v40_v53, %v39_v52  ;;  %v26_v63 = vld [vmem:[%s1256_s0 + $0x58] sm:$0xff] }
   0xf   :  { %v72_v57 = vld [vmem:[%s1256_s0 + $0x1c8] sm:$0xff]  ;;  %v99_v60 = vpack.c.bf16 %v56_v55, %v55_v54  ;;  %v41_v0 = vld [vmem:[%s1256_s0 + $0xd0] sm:$0xff]  ;;  %v42_v1 = vld [vmem:[%s1256_s0 + $0xd8] sm:$0xff]  ;;  %v84_v6 = vpack.c.bf16 %v26_v63, %v25_v62 }
  0x10   :  { %v107_v61 = vpack.c.bf16 %v72_v57, %v71_v56  ;;  %v57_v2 = vld [vmem:[%s1256_s0 + $0x150] sm:$0xff]  ;;  %v58_v3 = vld [vmem:[%s1256_s0 + $0x158] sm:$0xff]  ;;  %v92_v7 = vpack.c.bf16 %v42_v1, %v41_v0  ;;  %v27_v10 = vld [vmem:[%s1256_s0 + $0x60] sm:$0xff] }
  0x11   :  { %v73_v4 = vld [vmem:[%s1256_s0 + $0x1d0] sm:$0xff]  ;;  %v74_v5 = vld [vmem:[%s1256_s0 + $0x1d8] sm:$0xff]  ;;  %v100_v8 = vpack.c.bf16 %v58_v3, %v57_v2  ;;  %v28_v11 = vld [vmem:[%s1256_s0 + $0x68] sm:$0xff] }
  0x12   :  { %v108_v9 = vpack.c.bf16 %v74_v5, %v73_v4  ;;  %v43_v12 = vld [vmem:[%s1256_s0 + $0xe0] sm:$0xff]  ;;  %v44_v13 = vld [vmem:[%s1256_s0 + $0xe8] sm:$0xff]  ;;  %v85_v18 = vpack.c.bf16 %v28_v11, %v27_v10  ;;  %v61_v26 = vld [vmem:[%s1256_s0 + $0x170] sm:$0xff] }
  0x13   :  { %v59_v14 = vld [vmem:[%s1256_s0 + $0x160] sm:$0xff]  ;;  %v60_v15 = vld [vmem:[%s1256_s0 + $0x168] sm:$0xff]  ;;  %v93_v19 = vpack.c.bf16 %v44_v13, %v43_v12  ;;  %v62_v27 = vld [vmem:[%s1256_s0 + $0x178] sm:$0xff] }
  0x14   :  { %v75_v16 = vld [vmem:[%s1256_s0 + $0x1e0] sm:$0xff]  ;;  %v76_v17 = vld [vmem:[%s1256_s0 + $0x1e8] sm:$0xff]  ;;  %v101_v20 = vpack.c.bf16 %v60_v15, %v59_v14  ;;  %v77_v28 = vld [vmem:[%s1256_s0 + $0x1f0] sm:$0xff]  ;;  %v102_v32 = vpack.c.bf16 %v62_v27, %v61_v26 }
  0x15   :  { %v109_v21 = vpack.c.bf16 %v76_v17, %v75_v16  ;;  %v78_v29 = vld [vmem:[%s1256_s0 + $0x1f8] sm:$0xff] }
  0x16   :  { %648 = vmatmul.msk.bf16.gmra.mxu0 %vm116_vm1, %v80_v22  ;;  %656 = vmatmul.msk.bf16.gmra.mxu1 %vm116_vm1, %v88_v23  ;;  %v29_v22 = vld [vmem:[%s1256_s0 + $0x70] sm:$0xff]  ;;  %v30_v23 = vld [vmem:[%s1256_s0 + $0x78] sm:$0xff]  ;;  %v110_v33 = vpack.c.bf16 %v78_v29, %v77_v28 }
  0x17   :  { %664 = vmatmul.msk.bf16.gmra.mxu2 %vm116_vm1, %v96_v24  ;;  %v45_v24 = vld [vmem:[%s1256_s0 + $0xf0] sm:$0xff]  ;;  %v86_v30 = vpack.c.bf16 %v30_v23, %v29_v22 }
  0x18   :  { %672 = vmatmul.msk.bf16.gmra.mxu3 %vm116_vm1, %v104_v25  ;;  %v46_v25 = vld [vmem:[%s1256_s0 + $0xf8] sm:$0xff] }
  0x19   :  { %v94_v31 = vpack.c.bf16 %v46_v25, %v45_v24 }
  0x26   :  { %649 = vmatmul.msk.bf16.gmra.mxu0 %vm116_vm1, %v81_v34  ;;  %657 = vmatmul.msk.bf16.gmra.mxu1 %vm116_vm1, %v89_v35  ;;  %v933_v34 = vld [vmem:[%s1257_s2] ss:$0 sm:$0xff] }
  0x27   :  { %665 = vmatmul.msk.bf16.gmra.mxu2 %vm116_vm1, %v97_v36 }
  0x28   :  { %673 = vmatmul.msk.bf16.gmra.mxu3 %vm116_vm1, %v105_v37 }
  0x36   :  { %650 = vmatmul.msk.bf16.gmra.mxu0 %vm116_vm1, %v82_v46  ;;  %658 = vmatmul.msk.bf16.gmra.mxu1 %vm116_vm1, %v90_v47 }
  0x37   :  { %666 = vmatmul.msk.bf16.gmra.mxu2 %vm116_vm1, %v98_v48 }
  0x38   :  { %674 = vmatmul.msk.bf16.gmra.mxu3 %vm116_vm1, %v106_v49 }
  0x46   :  { %651 = vmatmul.msk.bf16.gmra.mxu0 %vm116_vm1, %v83_v58  ;;  %659 = vmatmul.msk.bf16.gmra.mxu1 %vm116_vm1, %v91_v59 }
  0x47   :  { %667 = vmatmul.msk.bf16.gmra.mxu2 %vm116_vm1, %v99_v60 }
  0x48   :  { %675 = vmatmul.msk.bf16.gmra.mxu3 %vm116_vm1, %v107_v61 }
  0x56   :  { %652 = vmatmul.msk.bf16.gmra.mxu0 %vm116_vm1, %v84_v6  ;;  %660 = vmatmul.msk.bf16.gmra.mxu1 %vm116_vm1, %v92_v7 }
  0x57   :  { %668 = vmatmul.msk.bf16.gmra.mxu2 %vm116_vm1, %v100_v8 }
  0x58   :  { %676 = vmatmul.msk.bf16.gmra.mxu3 %vm116_vm1, %v108_v9 }
  0x66   :  { %653 = vmatmul.msk.bf16.gmra.mxu0 %vm116_vm1, %v85_v18  ;;  %661 = vmatmul.msk.bf16.gmra.mxu1 %vm116_vm1, %v93_v19 }
  0x67   :  { %669 = vmatmul.msk.bf16.gmra.mxu2 %vm116_vm1, %v101_v20 }
  0x68   :  { %677 = vmatmul.msk.bf16.gmra.mxu3 %vm116_vm1, %v109_v21 }
  0x76   :  { %654 = vmatmul.msk.bf16.gmra.mxu0 %vm116_vm1, %v86_v30  ;;  %662 = vmatmul.msk.bf16.gmra.mxu1 %vm116_vm1, %v94_v31 }
  0x77   :  { %670 = vmatmul.msk.bf16.gmra.mxu2 %vm116_vm1, %v102_v32 }
  0x78   :  { %678 = vmatmul.msk.bf16.gmra.mxu3 %vm116_vm1, %v110_v33 }
  0x83   :  { %v226_v35 = vpop.f32.mrf.mxu0  ;;  %v266_v36 = vpop.f32.mrf.mxu1 }
  0x84   :  { %v227_v37 = vadd.f32 %v933_v34, %v226_v35  ;;  %v267_v38 = vadd.f32 %v933_v34, %v266_v36 }
  0x86   :  { %v386_v39 = vmax.f32 %v227_v37, 0.0  ;;  %v402_v40 = vmax.f32 %v267_v38, 0.0 }
  0x88   :  { %v450_v41 = vmin.f32 %v386_v39, 6.0  ;;  %v466_v42 = vmin.f32 %v402_v40, 6.0 }
  0x8a   :  { %v514_v43 = vpack.c.bf16 %v450_v41, %v450_v41  ;;  %v530_v44 = vpack.c.bf16 %v466_v42, %v466_v42  ;;  %v306_v45 = vpop.f32.mrf.mxu2 }
  0x8b   :  { %v346_v46 = vpop.f32.mrf.mxu3  ;;  %v307_v47 = vadd.f32 %v933_v34, %v306_v45  ;;  %v228_v49 = vpop.f32.mrf.mxu0 }
  0x8c   :  { %v347_v48 = vadd.f32 %v933_v34, %v346_v46  ;;  %v268_v50 = vpop.f32.mrf.mxu1  ;;  %579 = vst.msk [vmem:[%s1258_s3] sm:$0xf] %vm578_vm2, %v514_v43  ;;  %v229_v51 = vadd.f32 %v933_v34, %v228_v49 }
  0x8d   :  { %v269_v52 = vadd.f32 %v933_v34, %v268_v50  ;;  %595 = vst.msk [vmem:[%s1258_s3 + $0x40] sm:$0xf] %vm578_vm2, %v530_v44  ;;  %v418_v53 = vmax.f32 %v307_v47, 0.0 }
  0x8e   :  { %v434_v54 = vmax.f32 %v347_v48, 0.0  ;;  %v387_v55 = vmax.f32 %v229_v51, 0.0 }
  0x8f   :  { %v403_v56 = vmax.f32 %v269_v52, 0.0  ;;  %v482_v57 = vmin.f32 %v418_v53, 6.0 }
  0x90   :  { %v498_v58 = vmin.f32 %v434_v54, 6.0  ;;  %v451_v59 = vmin.f32 %v387_v55, 6.0 }
  0x91   :  { %v467_v60 = vmin.f32 %v403_v56, 6.0  ;;  %v546_v61 = vpack.c.bf16 %v482_v57, %v482_v57 }
  0x92   :  { %v562_v62 = vpack.c.bf16 %v498_v58, %v498_v58  ;;  %v515_v63 = vpack.c.bf16 %v451_v59, %v451_v59  ;;  %v308_v1 = vpop.f32.mrf.mxu2 }
  0x93   :  { %v531_v0 = vpack.c.bf16 %v467_v60, %v467_v60  ;;  %v348_v2 = vpop.f32.mrf.mxu3  ;;  %611 = vst.msk [vmem:[%s1258_s3 + $0x80] sm:$0xf] %vm578_vm2, %v546_v61  ;;  %v309_v3 = vadd.f32 %v933_v34, %v308_v1  ;;  %v231_v5 = vpop.f32.mrf.mxu0 }
  0x94   :  { %v349_v4 = vadd.f32 %v933_v34, %v348_v2  ;;  %v271_v6 = vpop.f32.mrf.mxu1  ;;  %627 = vst.msk [vmem:[%s1258_s3 + $0xc0] sm:$0xf] %vm578_vm2, %v562_v62  ;;  %v232_v7 = vadd.f32 %v933_v34, %v231_v5 }
  0x95   :  { %v272_v8 = vadd.f32 %v933_v34, %v271_v6  ;;  %580 = vst.msk [vmem:[%s1258_s3 + $0x4] sm:$0xf] %vm578_vm2, %v515_v63  ;;  %v419_v9 = vmax.f32 %v309_v3, 0.0 }
  0x96   :  { %v435_v10 = vmax.f32 %v349_v4, 0.0  ;;  %596 = vst.msk [vmem:[%s1258_s3 + $0x44] sm:$0xf] %vm578_vm2, %v531_v0  ;;  %v388_v11 = vmax.f32 %v232_v7, 0.0 }
  0x97   :  { %v404_v12 = vmax.f32 %v272_v8, 0.0  ;;  %v483_v13 = vmin.f32 %v419_v9, 6.0 }
  0x98   :  { %v499_v14 = vmin.f32 %v435_v10, 6.0  ;;  %v452_v15 = vmin.f32 %v388_v11, 6.0 }
  0x99   :  { %v468_v16 = vmin.f32 %v404_v12, 6.0  ;;  %v547_v17 = vpack.c.bf16 %v483_v13, %v483_v13 }
  0x9a   :  { %v563_v18 = vpack.c.bf16 %v499_v14, %v499_v14  ;;  %v516_v19 = vpack.c.bf16 %v452_v15, %v452_v15  ;;  %v311_v21 = vpop.f32.mrf.mxu2 }
  0x9b   :  { %v532_v20 = vpack.c.bf16 %v468_v16, %v468_v16  ;;  %v351_v22 = vpop.f32.mrf.mxu3  ;;  %612 = vst.msk [vmem:[%s1258_s3 + $0x84] sm:$0xf] %vm578_vm2, %v547_v17  ;;  %v312_v23 = vadd.f32 %v933_v34, %v311_v21  ;;  %v233_v25 = vpop.f32.mrf.mxu0 }
  0x9c   :  { %v352_v24 = vadd.f32 %v933_v34, %v351_v22  ;;  %v273_v26 = vpop.f32.mrf.mxu1  ;;  %628 = vst.msk [vmem:[%s1258_s3 + $0xc4] sm:$0xf] %vm578_vm2, %v563_v18  ;;  %v234_v27 = vadd.f32 %v933_v34, %v233_v25 }
  0x9d   :  { %v274_v28 = vadd.f32 %v933_v34, %v273_v26  ;;  %581 = vst.msk [vmem:[%s1258_s3 + $0x8] sm:$0xf] %vm578_vm2, %v516_v19  ;;  %v420_v29 = vmax.f32 %v312_v23, 0.0 }
  0x9e   :  { %v436_v30 = vmax.f32 %v352_v24, 0.0  ;;  %597 = vst.msk [vmem:[%s1258_s3 + $0x48] sm:$0xf] %vm578_vm2, %v532_v20  ;;  %v389_v31 = vmax.f32 %v234_v27, 0.0 }
  0x9f   :  { %v405_v32 = vmax.f32 %v274_v28, 0.0  ;;  %v484_v33 = vmin.f32 %v420_v29, 6.0 }
  0xa0   :  { %v500_v35 = vmin.f32 %v436_v30, 6.0  ;;  %v453_v36 = vmin.f32 %v389_v31, 6.0 }
  0xa1   :  { %v469_v37 = vmin.f32 %v405_v32, 6.0  ;;  %v548_v38 = vpack.c.bf16 %v484_v33, %v484_v33 }
  0xa2   :  { %v564_v39 = vpack.c.bf16 %v500_v35, %v500_v35  ;;  %v517_v40 = vpack.c.bf16 %v453_v36, %v453_v36  ;;  %v313_v42 = vpop.f32.mrf.mxu2 }
  0xa3   :  { %v533_v41 = vpack.c.bf16 %v469_v37, %v469_v37  ;;  %v353_v43 = vpop.f32.mrf.mxu3  ;;  %613 = vst.msk [vmem:[%s1258_s3 + $0x88] sm:$0xf] %vm578_vm2, %v548_v38  ;;  %v314_v44 = vadd.f32 %v933_v34, %v313_v42  ;;  %v236_v46 = vpop.f32.mrf.mxu0 }
  0xa4   :  { %v354_v45 = vadd.f32 %v933_v34, %v353_v43  ;;  %v276_v47 = vpop.f32.mrf.mxu1  ;;  %629 = vst.msk [vmem:[%s1258_s3 + $0xc8] sm:$0xf] %vm578_vm2, %v564_v39  ;;  %v237_v48 = vadd.f32 %v933_v34, %v236_v46 }
  0xa5   :  { %v277_v49 = vadd.f32 %v933_v34, %v276_v47  ;;  %582 = vst.msk [vmem:[%s1258_s3 + $0xc] sm:$0xf] %vm578_vm2, %v517_v40  ;;  %v421_v50 = vmax.f32 %v314_v44, 0.0 }
  0xa6   :  { %v437_v51 = vmax.f32 %v354_v45, 0.0  ;;  %598 = vst.msk [vmem:[%s1258_s3 + $0x4c] sm:$0xf] %vm578_vm2, %v533_v41  ;;  %v390_v52 = vmax.f32 %v237_v48, 0.0 }
  0xa7   :  { %v406_v53 = vmax.f32 %v277_v49, 0.0  ;;  %v485_v54 = vmin.f32 %v421_v50, 6.0 }
  0xa8   :  { %v501_v55 = vmin.f32 %v437_v51, 6.0  ;;  %v454_v56 = vmin.f32 %v390_v52, 6.0 }
  0xa9   :  { %v470_v57 = vmin.f32 %v406_v53, 6.0  ;;  %v549_v58 = vpack.c.bf16 %v485_v54, %v485_v54 }
  0xaa   :  { %v565_v59 = vpack.c.bf16 %v501_v55, %v501_v55  ;;  %v518_v60 = vpack.c.bf16 %v454_v56, %v454_v56  ;;  %v316_v62 = vpop.f32.mrf.mxu2 }
  0xab   :  { %v534_v61 = vpack.c.bf16 %v470_v57, %v470_v57  ;;  %v356_v63 = vpop.f32.mrf.mxu3  ;;  %614 = vst.msk [vmem:[%s1258_s3 + $0x8c] sm:$0xf] %vm578_vm2, %v549_v58  ;;  %v317_v0 = vadd.f32 %v933_v34, %v316_v62  ;;  %v238_v2 = vpop.f32.mrf.mxu0 }
  0xac   :  { %v357_v1 = vadd.f32 %v933_v34, %v356_v63  ;;  %v278_v3 = vpop.f32.mrf.mxu1  ;;  %630 = vst.msk [vmem:[%s1258_s3 + $0xcc] sm:$0xf] %vm578_vm2, %v565_v59  ;;  %v239_v4 = vadd.f32 %v933_v34, %v238_v2 }
  0xad   :  { %v279_v5 = vadd.f32 %v933_v34, %v278_v3  ;;  %583 = vst.msk [vmem:[%s1258_s3 + $0x10] sm:$0xf] %vm578_vm2, %v518_v60  ;;  %v422_v6 = vmax.f32 %v317_v0, 0.0 }
  0xae   :  { %v438_v7 = vmax.f32 %v357_v1, 0.0  ;;  %599 = vst.msk [vmem:[%s1258_s3 + $0x50] sm:$0xf] %vm578_vm2, %v534_v61  ;;  %v391_v8 = vmax.f32 %v239_v4, 0.0 }
  0xaf   :  { %v407_v9 = vmax.f32 %v279_v5, 0.0  ;;  %v486_v10 = vmin.f32 %v422_v6, 6.0 }
  0xb0   :  { %v502_v11 = vmin.f32 %v438_v7, 6.0  ;;  %v455_v12 = vmin.f32 %v391_v8, 6.0 }
  0xb1   :  { %v471_v13 = vmin.f32 %v407_v9, 6.0  ;;  %v550_v14 = vpack.c.bf16 %v486_v10, %v486_v10 }
  0xb2   :  { %v566_v15 = vpack.c.bf16 %v502_v11, %v502_v11  ;;  %v519_v16 = vpack.c.bf16 %v455_v12, %v455_v12  ;;  %v318_v18 = vpop.f32.mrf.mxu2 }
  0xb3   :  { %v535_v17 = vpack.c.bf16 %v471_v13, %v471_v13  ;;  %v358_v19 = vpop.f32.mrf.mxu3  ;;  %615 = vst.msk [vmem:[%s1258_s3 + $0x90] sm:$0xf] %vm578_vm2, %v550_v14  ;;  %v319_v20 = vadd.f32 %v933_v34, %v318_v18  ;;  %v241_v22 = vpop.f32.mrf.mxu0 }
  0xb4   :  { %v359_v21 = vadd.f32 %v933_v34, %v358_v19  ;;  %v281_v23 = vpop.f32.mrf.mxu1  ;;  %631 = vst.msk [vmem:[%s1258_s3 + $0xd0] sm:$0xf] %vm578_vm2, %v566_v15  ;;  %v242_v24 = vadd.f32 %v933_v34, %v241_v22 }
  0xb5   :  { %v282_v25 = vadd.f32 %v933_v34, %v281_v23  ;;  %584 = vst.msk [vmem:[%s1258_s3 + $0x14] sm:$0xf] %vm578_vm2, %v519_v16  ;;  %v423_v26 = vmax.f32 %v319_v20, 0.0 }
  0xb6   :  { %v439_v27 = vmax.f32 %v359_v21, 0.0  ;;  %600 = vst.msk [vmem:[%s1258_s3 + $0x54] sm:$0xf] %vm578_vm2, %v535_v17  ;;  %v392_v28 = vmax.f32 %v242_v24, 0.0 }
  0xb7   :  { %v408_v29 = vmax.f32 %v282_v25, 0.0  ;;  %v487_v30 = vmin.f32 %v423_v26, 6.0 }
  0xb8   :  { %v503_v31 = vmin.f32 %v439_v27, 6.0  ;;  %v456_v32 = vmin.f32 %v392_v28, 6.0 }
  0xb9   :  { %v472_v33 = vmin.f32 %v408_v29, 6.0  ;;  %v551_v35 = vpack.c.bf16 %v487_v30, %v487_v30 }
  0xba   :  { %v567_v36 = vpack.c.bf16 %v503_v31, %v503_v31  ;;  %v520_v37 = vpack.c.bf16 %v456_v32, %v456_v32  ;;  %v321_v39 = vpop.f32.mrf.mxu2 }
  0xbb   :  { %v536_v38 = vpack.c.bf16 %v472_v33, %v472_v33  ;;  %v361_v40 = vpop.f32.mrf.mxu3  ;;  %616 = vst.msk [vmem:[%s1258_s3 + $0x94] sm:$0xf] %vm578_vm2, %v551_v35  ;;  %v322_v41 = vadd.f32 %v933_v34, %v321_v39  ;;  %v243_v43 = vpop.f32.mrf.mxu0 }
  0xbc   :  { %v362_v42 = vadd.f32 %v933_v34, %v361_v40  ;;  %v283_v44 = vpop.f32.mrf.mxu1  ;;  %632 = vst.msk [vmem:[%s1258_s3 + $0xd4] sm:$0xf] %vm578_vm2, %v567_v36  ;;  %v244_v45 = vadd.f32 %v933_v34, %v243_v43 }
  0xbd   :  { %v284_v46 = vadd.f32 %v933_v34, %v283_v44  ;;  %585 = vst.msk [vmem:[%s1258_s3 + $0x18] sm:$0xf] %vm578_vm2, %v520_v37  ;;  %v424_v47 = vmax.f32 %v322_v41, 0.0 }
  0xbe   :  { %v440_v48 = vmax.f32 %v362_v42, 0.0  ;;  %601 = vst.msk [vmem:[%s1258_s3 + $0x58] sm:$0xf] %vm578_vm2, %v536_v38  ;;  %v393_v49 = vmax.f32 %v244_v45, 0.0 }
  0xbf   :  { %v409_v50 = vmax.f32 %v284_v46, 0.0  ;;  %v488_v51 = vmin.f32 %v424_v47, 6.0 }
  0xc0   :  { %v504_v52 = vmin.f32 %v440_v48, 6.0  ;;  %v457_v53 = vmin.f32 %v393_v49, 6.0 }
  0xc1   :  { %v473_v54 = vmin.f32 %v409_v50, 6.0  ;;  %v552_v55 = vpack.c.bf16 %v488_v51, %v488_v51 }
  0xc2   :  { %v568_v56 = vpack.c.bf16 %v504_v52, %v504_v52  ;;  %v521_v57 = vpack.c.bf16 %v457_v53, %v457_v53  ;;  %v323_v59 = vpop.f32.mrf.mxu2 }
  0xc3   :  { %v537_v58 = vpack.c.bf16 %v473_v54, %v473_v54  ;;  %v363_v60 = vpop.f32.mrf.mxu3  ;;  %617 = vst.msk [vmem:[%s1258_s3 + $0x98] sm:$0xf] %vm578_vm2, %v552_v55  ;;  %v324_v61 = vadd.f32 %v933_v34, %v323_v59  ;;  %v246_v63 = vpop.f32.mrf.mxu0 }
  0xc4   :  { %v364_v62 = vadd.f32 %v933_v34, %v363_v60  ;;  %v286_v0 = vpop.f32.mrf.mxu1  ;;  %633 = vst.msk [vmem:[%s1258_s3 + $0xd8] sm:$0xf] %vm578_vm2, %v568_v56  ;;  %v247_v1 = vadd.f32 %v933_v34, %v246_v63 }
  0xc5   :  { %v287_v2 = vadd.f32 %v933_v34, %v286_v0  ;;  %586 = vst.msk [vmem:[%s1258_s3 + $0x1c] sm:$0xf] %vm578_vm2, %v521_v57  ;;  %v425_v3 = vmax.f32 %v324_v61, 0.0 }
  0xc6   :  { %v441_v4 = vmax.f32 %v364_v62, 0.0  ;;  %602 = vst.msk [vmem:[%s1258_s3 + $0x5c] sm:$0xf] %vm578_vm2, %v537_v58  ;;  %v394_v5 = vmax.f32 %v247_v1, 0.0 }
  0xc7   :  { %v410_v6 = vmax.f32 %v287_v2, 0.0  ;;  %v489_v7 = vmin.f32 %v425_v3, 6.0 }
  0xc8   :  { %v505_v8 = vmin.f32 %v441_v4, 6.0  ;;  %v458_v9 = vmin.f32 %v394_v5, 6.0 }
  0xc9   :  { %v474_v10 = vmin.f32 %v410_v6, 6.0  ;;  %v553_v11 = vpack.c.bf16 %v489_v7, %v489_v7 }
  0xca   :  { %v569_v12 = vpack.c.bf16 %v505_v8, %v505_v8  ;;  %v522_v13 = vpack.c.bf16 %v458_v9, %v458_v9  ;;  %v326_v15 = vpop.f32.mrf.mxu2 }
  0xcb   :  { %v538_v14 = vpack.c.bf16 %v474_v10, %v474_v10  ;;  %v366_v16 = vpop.f32.mrf.mxu3  ;;  %618 = vst.msk [vmem:[%s1258_s3 + $0x9c] sm:$0xf] %vm578_vm2, %v553_v11  ;;  %v327_v17 = vadd.f32 %v933_v34, %v326_v15  ;;  %v248_v19 = vpop.f32.mrf.mxu0 }
  0xcc   :  { %v367_v18 = vadd.f32 %v933_v34, %v366_v16  ;;  %v288_v20 = vpop.f32.mrf.mxu1  ;;  %634 = vst.msk [vmem:[%s1258_s3 + $0xdc] sm:$0xf] %vm578_vm2, %v569_v12  ;;  %v249_v21 = vadd.f32 %v933_v34, %v248_v19 }
  0xcd   :  { %v289_v22 = vadd.f32 %v933_v34, %v288_v20  ;;  %587 = vst.msk [vmem:[%s1258_s3 + $0x20] sm:$0xf] %vm578_vm2, %v522_v13  ;;  %v426_v23 = vmax.f32 %v327_v17, 0.0 }
  0xce   :  { %v442_v24 = vmax.f32 %v367_v18, 0.0  ;;  %603 = vst.msk [vmem:[%s1258_s3 + $0x60] sm:$0xf] %vm578_vm2, %v538_v14  ;;  %v395_v25 = vmax.f32 %v249_v21, 0.0 }
  0xcf   :  { %v411_v26 = vmax.f32 %v289_v22, 0.0  ;;  %v490_v27 = vmin.f32 %v426_v23, 6.0 }
  0xd0   :  { %v506_v28 = vmin.f32 %v442_v24, 6.0  ;;  %v459_v29 = vmin.f32 %v395_v25, 6.0 }
  0xd1   :  { %v475_v30 = vmin.f32 %v411_v26, 6.0  ;;  %v554_v31 = vpack.c.bf16 %v490_v27, %v490_v27 }
  0xd2   :  { %v570_v32 = vpack.c.bf16 %v506_v28, %v506_v28  ;;  %v523_v33 = vpack.c.bf16 %v459_v29, %v459_v29  ;;  %v328_v36 = vpop.f32.mrf.mxu2 }
  0xd3   :  { %v539_v35 = vpack.c.bf16 %v475_v30, %v475_v30  ;;  %v368_v37 = vpop.f32.mrf.mxu3  ;;  %619 = vst.msk [vmem:[%s1258_s3 + $0xa0] sm:$0xf] %vm578_vm2, %v554_v31  ;;  %v329_v38 = vadd.f32 %v933_v34, %v328_v36  ;;  %v251_v40 = vpop.f32.mrf.mxu0 }
  0xd4   :  { %v369_v39 = vadd.f32 %v933_v34, %v368_v37  ;;  %v291_v41 = vpop.f32.mrf.mxu1  ;;  %635 = vst.msk [vmem:[%s1258_s3 + $0xe0] sm:$0xf] %vm578_vm2, %v570_v32  ;;  %v252_v42 = vadd.f32 %v933_v34, %v251_v40 }
  0xd5   :  { %v292_v43 = vadd.f32 %v933_v34, %v291_v41  ;;  %588 = vst.msk [vmem:[%s1258_s3 + $0x24] sm:$0xf] %vm578_vm2, %v523_v33  ;;  %v427_v44 = vmax.f32 %v329_v38, 0.0 }
  0xd6   :  { %v443_v45 = vmax.f32 %v369_v39, 0.0  ;;  %604 = vst.msk [vmem:[%s1258_s3 + $0x64] sm:$0xf] %vm578_vm2, %v539_v35  ;;  %v396_v46 = vmax.f32 %v252_v42, 0.0 }
  0xd7   :  { %v412_v47 = vmax.f32 %v292_v43, 0.0  ;;  %v491_v48 = vmin.f32 %v427_v44, 6.0 }
  0xd8   :  { %v507_v49 = vmin.f32 %v443_v45, 6.0  ;;  %v460_v50 = vmin.f32 %v396_v46, 6.0 }
  0xd9   :  { %v476_v51 = vmin.f32 %v412_v47, 6.0  ;;  %v555_v52 = vpack.c.bf16 %v491_v48, %v491_v48 }
  0xda   :  { %v571_v53 = vpack.c.bf16 %v507_v49, %v507_v49  ;;  %v524_v54 = vpack.c.bf16 %v460_v50, %v460_v50  ;;  %v331_v56 = vpop.f32.mrf.mxu2 }
  0xdb   :  { %v540_v55 = vpack.c.bf16 %v476_v51, %v476_v51  ;;  %v371_v57 = vpop.f32.mrf.mxu3  ;;  %620 = vst.msk [vmem:[%s1258_s3 + $0xa4] sm:$0xf] %vm578_vm2, %v555_v52  ;;  %v332_v58 = vadd.f32 %v933_v34, %v331_v56  ;;  %v253_v60 = vpop.f32.mrf.mxu0 }
  0xdc   :  { %v372_v59 = vadd.f32 %v933_v34, %v371_v57  ;;  %v293_v61 = vpop.f32.mrf.mxu1  ;;  %636 = vst.msk [vmem:[%s1258_s3 + $0xe4] sm:$0xf] %vm578_vm2, %v571_v53  ;;  %v254_v62 = vadd.f32 %v933_v34, %v253_v60 }
  0xdd   :  { %v294_v63 = vadd.f32 %v933_v34, %v293_v61  ;;  %589 = vst.msk [vmem:[%s1258_s3 + $0x28] sm:$0xf] %vm578_vm2, %v524_v54  ;;  %v428_v0 = vmax.f32 %v332_v58, 0.0 }
  0xde   :  { %v444_v1 = vmax.f32 %v372_v59, 0.0  ;;  %605 = vst.msk [vmem:[%s1258_s3 + $0x68] sm:$0xf] %vm578_vm2, %v540_v55  ;;  %v397_v2 = vmax.f32 %v254_v62, 0.0 }
  0xdf   :  { %v413_v3 = vmax.f32 %v294_v63, 0.0  ;;  %v492_v4 = vmin.f32 %v428_v0, 6.0 }
  0xe0   :  { %v508_v5 = vmin.f32 %v444_v1, 6.0  ;;  %v461_v6 = vmin.f32 %v397_v2, 6.0 }
  0xe1   :  { %v477_v7 = vmin.f32 %v413_v3, 6.0  ;;  %v556_v8 = vpack.c.bf16 %v492_v4, %v492_v4 }
  0xe2   :  { %v572_v9 = vpack.c.bf16 %v508_v5, %v508_v5  ;;  %v525_v10 = vpack.c.bf16 %v461_v6, %v461_v6  ;;  %v333_v12 = vpop.f32.mrf.mxu2 }
  0xe3   :  { %v541_v11 = vpack.c.bf16 %v477_v7, %v477_v7  ;;  %v373_v13 = vpop.f32.mrf.mxu3  ;;  %621 = vst.msk [vmem:[%s1258_s3 + $0xa8] sm:$0xf] %vm578_vm2, %v556_v8  ;;  %v334_v14 = vadd.f32 %v933_v34, %v333_v12  ;;  %v256_v16 = vpop.f32.mrf.mxu0 }
  0xe4   :  { %v374_v15 = vadd.f32 %v933_v34, %v373_v13  ;;  %v296_v17 = vpop.f32.mrf.mxu1  ;;  %637 = vst.msk [vmem:[%s1258_s3 + $0xe8] sm:$0xf] %vm578_vm2, %v572_v9  ;;  %v257_v18 = vadd.f32 %v933_v34, %v256_v16 }
  0xe5   :  { %v297_v19 = vadd.f32 %v933_v34, %v296_v17  ;;  %590 = vst.msk [vmem:[%s1258_s3 + $0x2c] sm:$0xf] %vm578_vm2, %v525_v10  ;;  %v429_v20 = vmax.f32 %v334_v14, 0.0 }
  0xe6   :  { %v445_v21 = vmax.f32 %v374_v15, 0.0  ;;  %606 = vst.msk [vmem:[%s1258_s3 + $0x6c] sm:$0xf] %vm578_vm2, %v541_v11  ;;  %v398_v22 = vmax.f32 %v257_v18, 0.0 }
  0xe7   :  { %v414_v23 = vmax.f32 %v297_v19, 0.0  ;;  %v493_v24 = vmin.f32 %v429_v20, 6.0 }
  0xe8   :  { %v509_v25 = vmin.f32 %v445_v21, 6.0  ;;  %v462_v26 = vmin.f32 %v398_v22, 6.0 }
  0xe9   :  { %v478_v27 = vmin.f32 %v414_v23, 6.0  ;;  %v557_v28 = vpack.c.bf16 %v493_v24, %v493_v24 }
  0xea   :  { %v573_v29 = vpack.c.bf16 %v509_v25, %v509_v25  ;;  %v526_v30 = vpack.c.bf16 %v462_v26, %v462_v26  ;;  %v336_v32 = vpop.f32.mrf.mxu2 }
  0xeb   :  { %v542_v31 = vpack.c.bf16 %v478_v27, %v478_v27  ;;  %v376_v33 = vpop.f32.mrf.mxu3  ;;  %622 = vst.msk [vmem:[%s1258_s3 + $0xac] sm:$0xf] %vm578_vm2, %v557_v28  ;;  %v337_v35 = vadd.f32 %v933_v34, %v336_v32  ;;  %v258_v37 = vpop.f32.mrf.mxu0 }
  0xec   :  { %v377_v36 = vadd.f32 %v933_v34, %v376_v33  ;;  %v298_v38 = vpop.f32.mrf.mxu1  ;;  %638 = vst.msk [vmem:[%s1258_s3 + $0xec] sm:$0xf] %vm578_vm2, %v573_v29  ;;  %v259_v39 = vadd.f32 %v933_v34, %v258_v37 }
  0xed   :  { %v299_v40 = vadd.f32 %v933_v34, %v298_v38  ;;  %591 = vst.msk [vmem:[%s1258_s3 + $0x30] sm:$0xf] %vm578_vm2, %v526_v30  ;;  %v430_v41 = vmax.f32 %v337_v35, 0.0 }
  0xee   :  { %v446_v42 = vmax.f32 %v377_v36, 0.0  ;;  %607 = vst.msk [vmem:[%s1258_s3 + $0x70] sm:$0xf] %vm578_vm2, %v542_v31  ;;  %v399_v43 = vmax.f32 %v259_v39, 0.0 }
  0xef   :  { %v415_v44 = vmax.f32 %v299_v40, 0.0  ;;  %v494_v45 = vmin.f32 %v430_v41, 6.0 }
  0xf0   :  { %v510_v46 = vmin.f32 %v446_v42, 6.0  ;;  %v463_v47 = vmin.f32 %v399_v43, 6.0 }
  0xf1   :  { %v479_v48 = vmin.f32 %v415_v44, 6.0  ;;  %v558_v49 = vpack.c.bf16 %v494_v45, %v494_v45 }
  0xf2   :  { %v574_v50 = vpack.c.bf16 %v510_v46, %v510_v46  ;;  %v527_v51 = vpack.c.bf16 %v463_v47, %v463_v47  ;;  %v338_v53 = vpop.f32.mrf.mxu2 }
  0xf3   :  { %v543_v52 = vpack.c.bf16 %v479_v48, %v479_v48  ;;  %v378_v54 = vpop.f32.mrf.mxu3  ;;  %623 = vst.msk [vmem:[%s1258_s3 + $0xb0] sm:$0xf] %vm578_vm2, %v558_v49  ;;  %v339_v55 = vadd.f32 %v933_v34, %v338_v53  ;;  %v261_v57 = vpop.f32.mrf.mxu0 }
  0xf4   :  { %v379_v56 = vadd.f32 %v933_v34, %v378_v54  ;;  %v301_v58 = vpop.f32.mrf.mxu1  ;;  %639 = vst.msk [vmem:[%s1258_s3 + $0xf0] sm:$0xf] %vm578_vm2, %v574_v50  ;;  %v262_v59 = vadd.f32 %v933_v34, %v261_v57 }
  0xf5   :  { %v302_v60 = vadd.f32 %v933_v34, %v301_v58  ;;  %592 = vst.msk [vmem:[%s1258_s3 + $0x34] sm:$0xf] %vm578_vm2, %v527_v51  ;;  %v431_v61 = vmax.f32 %v339_v55, 0.0 }
  0xf6   :  { %v447_v62 = vmax.f32 %v379_v56, 0.0  ;;  %608 = vst.msk [vmem:[%s1258_s3 + $0x74] sm:$0xf] %vm578_vm2, %v543_v52  ;;  %v400_v63 = vmax.f32 %v262_v59, 0.0 }
  0xf7   :  { %v416_v0 = vmax.f32 %v302_v60, 0.0  ;;  %v495_v1 = vmin.f32 %v431_v61, 6.0 }
  0xf8   :  { %v511_v2 = vmin.f32 %v447_v62, 6.0  ;;  %v464_v3 = vmin.f32 %v400_v63, 6.0 }
  0xf9   :  { %v480_v4 = vmin.f32 %v416_v0, 6.0  ;;  %v559_v5 = vpack.c.bf16 %v495_v1, %v495_v1 }
  0xfa   :  { %v575_v6 = vpack.c.bf16 %v511_v2, %v511_v2  ;;  %v528_v7 = vpack.c.bf16 %v464_v3, %v464_v3  ;;  %v341_v9 = vpop.f32.mrf.mxu2 }
  0xfb   :  { %v544_v8 = vpack.c.bf16 %v480_v4, %v480_v4  ;;  %v381_v10 = vpop.f32.mrf.mxu3  ;;  %624 = vst.msk [vmem:[%s1258_s3 + $0xb4] sm:$0xf] %vm578_vm2, %v559_v5  ;;  %v342_v11 = vadd.f32 %v933_v34, %v341_v9  ;;  %v263_v13 = vpop.f32.mrf.mxu0 }
  0xfc   :  { %v382_v12 = vadd.f32 %v933_v34, %v381_v10  ;;  %v303_v14 = vpop.f32.mrf.mxu1  ;;  %640 = vst.msk [vmem:[%s1258_s3 + $0xf4] sm:$0xf] %vm578_vm2, %v575_v6  ;;  %v264_v15 = vadd.f32 %v933_v34, %v263_v13 }
  0xfd   :  { %v304_v16 = vadd.f32 %v933_v34, %v303_v14  ;;  %593 = vst.msk [vmem:[%s1258_s3 + $0x38] sm:$0xf] %vm578_vm2, %v528_v7  ;;  %v432_v17 = vmax.f32 %v342_v11, 0.0 }
  0xfe   :  { %v448_v18 = vmax.f32 %v382_v12, 0.0  ;;  %609 = vst.msk [vmem:[%s1258_s3 + $0x78] sm:$0xf] %vm578_vm2, %v544_v8  ;;  %v401_v19 = vmax.f32 %v264_v15, 0.0 }
  0xff   :  { %v417_v20 = vmax.f32 %v304_v16, 0.0  ;;  %v496_v21 = vmin.f32 %v432_v17, 6.0 }
 0x100   :  { %v512_v22 = vmin.f32 %v448_v18, 6.0  ;;  %v465_v23 = vmin.f32 %v401_v19, 6.0 }
 0x101   :  { %v481_v24 = vmin.f32 %v417_v20, 6.0  ;;  %v560_v25 = vpack.c.bf16 %v496_v21, %v496_v21 }
 0x102   :  { %v576_v26 = vpack.c.bf16 %v512_v22, %v512_v22  ;;  %v529_v27 = vpack.c.bf16 %v465_v23, %v465_v23  ;;  %v343_v29 = vpop.f32.mrf.mxu2 }
 0x103   :  { %v545_v28 = vpack.c.bf16 %v481_v24, %v481_v24  ;;  %v383_v30 = vpop.f32.mrf.mxu3  ;;  %625 = vst.msk [vmem:[%s1258_s3 + $0xb8] sm:$0xf] %vm578_vm2, %v560_v25  ;;  %v344_v31 = vadd.f32 %v933_v34, %v343_v29 }
 0x104   :  { %v384_v32 = vadd.f32 %v933_v34, %v383_v30  ;;  %641 = vst.msk [vmem:[%s1258_s3 + $0xf8] sm:$0xf] %vm578_vm2, %v576_v26 }
 0x105   :  { %594 = vst.msk [vmem:[%s1258_s3 + $0x3c] sm:$0xf] %vm578_vm2, %v529_v27  ;;  %v433_v33 = vmax.f32 %v344_v31, 0.0 }
 0x106   :  { %v449_v35 = vmax.f32 %v384_v32, 0.0  ;;  %610 = vst.msk [vmem:[%s1258_s3 + $0x7c] sm:$0xf] %vm578_vm2, %v545_v28 }
 0x107   :  { %v497_v36 = vmin.f32 %v433_v33, 6.0 }
 0x108   :  { %v513_v37 = vmin.f32 %v449_v35, 6.0 }
 0x109   :  { %v561_v34 = vpack.c.bf16 %v497_v36, %v497_v36 }
 0x10a   :  { %v577_v38 = vpack.c.bf16 %v513_v37, %v513_v37 }
 0x10b   :  { %626 = vst.msk [vmem:[%s1258_s3 + $0xbc] sm:$0xf] %vm578_vm2, %v561_v34 }
 0x10c   :  { %642 = vst.msk [vmem:[%s1258_s3 + $0xfc] sm:$0xf] %vm578_vm2, %v577_v38 }

</bundles_post_ra>
